<compile_context>
chip_gen: v7x
topology: tpu7x:2x2x1
jax: 0.10.0
libtpu: 0.0.40
codegen_flags: <defaults>
</compile_context>

<pallas_src>
import functools

import numpy as np
import jax
import jax.numpy as jnp
from jax.experimental import pallas as pl
from jax.experimental.pallas import tpu as pltpu


_LANES = 128       # lane width of a TPU vreg
_SUMM_ROWS = 8     # per-region summary rows emitted by the kernel


def _msi_kernel(p_ref, s_ref, summ_ref,
                loss0_ref, cnt_ref, prevp_ref, prevs_ref, seen_ref,
                pres_ref, pren_ref, psum_ref, pcnt_ref,
                *, t_total, tile_t):
    """Per-region run-length statistics of calculate_mean_squared_increment.

    Summary rows (written once, at the last time chunk):
      0: pre_S   - squared-increment sum of the first equal-sign run
      1: pre_n   - length of that first run
      2: has_brk - 1.0 if any sign change occurred in this region
      3: post_S  - sum of segment means flushed after the first sign change
      4: post_n  - number of such segment means
      5: tail_L  - loss0 left at the end of the region (never reset)
      6: tail_C  - cnt   left at the end of the region (never reset)
      7: unused
    """
    tc = pl.program_id(1)
    n_tc = pl.num_programs(1)

    @pl.when(tc == 0)
    def _init():
        zero = jnp.zeros_like(loss0_ref)
        loss0_ref[...] = zero
        cnt_ref[...] = zero
        seen_ref[...] = zero
        pres_ref[...] = zero
        pren_ref[...] = zero
        psum_ref[...] = zero
        pcnt_ref[...] = zero
        prevp_ref[...] = p_ref[0]
        prevs_ref[...] = s_ref[0]

    # Valid rows of this chunk; global row 0 is only ever used as "previous day"
    # and trailing time padding is never touched.
    t_lo = jnp.where(tc == 0, 1, 0)
    t_hi = jnp.minimum(tile_t, t_total - tc * tile_t)

    def body(t, carry):
        loss0, cnt, prevp, prevs, seen, pre_s, pre_n, post_s, post_c = carry
        p_t = p_ref[t]                       # (SG, 128)
        s_t = s_ref[t]

        eq = s_t == prevs
        diff = p_t - prevp
        sq = diff * diff

        brk = jnp.logical_not(eq)
        flush = jnp.logical_and(brk, cnt > 0.0)
        seg_mean = loss0 / jnp.maximum(cnt, 1.0)

        # Segment means flushed *after* the first sign change are independent of
        # the state carried in from the previous region -> accumulate them here.
        # (NaN segment means are skipped, matching np.nanmean.)
        seen_b = seen > 0.5
        ok = jnp.logical_and(jnp.logical_and(flush, seen_b),
                             jnp.logical_not(jnp.isnan(seg_mean)))
        post_s = post_s + jnp.where(ok, seg_mean, 0.0)
        post_c = post_c + jnp.where(ok, 1.0, 0.0)

        new_loss0 = jnp.where(eq, loss0 + sq, 0.0)
        new_cnt = jnp.where(eq, cnt + 1.0, 0.0)

        # First-run prefix: tracks the running state until the first sign change,
        # then stays frozen at its pre-reset value.
        pre_s = jnp.where(seen_b, pre_s, jnp.where(eq, new_loss0, loss0))
        pre_n = jnp.where(seen_b, pre_n, jnp.where(eq, new_cnt, cnt))
        seen = jnp.maximum(seen, brk.astype(jnp.float32))

        return (new_loss0, new_cnt, p_t, s_t, seen, pre_s, pre_n, post_s, post_c)

    carry = jax.lax.fori_loop(
        t_lo, t_hi, body,
        (loss0_ref[...], cnt_ref[...], prevp_ref[...], prevs_ref[...],
         seen_ref[...], pres_ref[...], pren_ref[...],
         psum_ref[...], pcnt_ref[...]))
    loss0, cnt, prevp, prevs, seen, pre_s, pre_n, post_s, post_c = carry

    loss0_ref[...] = loss0
    cnt_ref[...] = cnt
    prevp_ref[...] = prevp
    prevs_ref[...] = prevs
    seen_ref[...] = seen
    pres_ref[...] = pre_s
    pren_ref[...] = pre_n
    psum_ref[...] = post_s
    pcnt_ref[...] = post_c

    @pl.when(tc == n_tc - 1)
    def _finalize():
        summ_ref[0] = pre_s
        summ_ref[1] = pre_n
        summ_ref[2] = seen
        summ_ref[3] = post_s
        summ_ref[4] = post_c
        summ_ref[5] = loss0
        summ_ref[6] = cnt
        summ_ref[7] = jnp.zeros_like(cnt)


def rmse_loss_mcp(output, results, *, tile_t=512):
    """JAX/Pallas equivalent of RmseLoss_mcp.forward(output, results)."""
    t_total = int(output.shape[0])
    n_regions = int(output.shape[1])

    p0 = output[:, :, 0].astype(jnp.float32)    # [T, B] prediction values
    s0 = results[:, :, 0].astype(jnp.float32)   # [T, B] rain-sign values

    lanes = _LANES
    n_groups = -(-n_regions // lanes)           # ceil(B / 128)
    sg = min(8, n_groups)                       # sublane groups per block
    g_pad = -(-n_groups // sg) * sg
    b_pad = g_pad * lanes

    tile_t = max(8, min(int(tile_t), -(-t_total // 8) * 8))
    tile_t = (tile_t // 8) * 8
    n_tc = -(-t_total // tile_t)
    t_pad = n_tc * tile_t
    n_bb = g_pad // sg

    # One fused slice+cast+pad+reshape per plane; pad content is never read
    # (time padding is skipped via the dynamic trip count, padded regions are
    # dropped before the stitch scan).
    p_p = jnp.pad(p0, ((0, t_pad - t_total), (0, b_pad - n_regions)))
    s_p = jnp.pad(s0, ((0, t_pad - t_total), (0, b_pad - n_regions)))
    p_p = p_p.reshape(t_pad, g_pad, lanes)
    s_p = s_p.reshape(t_pad, g_pad, lanes)

    kernel = functools.partial(_msi_kernel, t_total=t_total, tile_t=tile_t)

    in_spec = pl.BlockSpec((tile_t, sg, lanes), lambda b, t: (t, b, 0))
    out_spec = pl.BlockSpec((_SUMM_ROWS, sg, lanes), lambda b, t: (b, 0, 0))
    state = pltpu.VMEM((sg, lanes), jnp.float32)

    summ = pl.pallas_call(
        kernel,
        out_shape=jax.ShapeDtypeStruct((n_bb * _SUMM_ROWS, sg, lanes), jnp.float32),
        grid_spec=pltpu.PrefetchScalarGridSpec(
            num_scalar_prefetch=0,
            grid=(n_bb, n_tc),
            in_specs=[in_spec, in_spec],
            out_specs=out_spec,
            scratch_shapes=[state] * 9,
        ),
        compiler_params=pltpu.CompilerParams(
            dimension_semantics=("parallel", "arbitrary"),
        ),
        cost_estimate=pl.CostEstimate(
            flops=20 * t_pad * b_pad,
            transcendentals=0,
            bytes_accessed=2 * 4 * t_pad * b_pad + 4 * n_bb * _SUMM_ROWS * sg * lanes,
        ),
    )(p_p, s_p)

    summ = summ.reshape(n_bb, _SUMM_ROWS, sg, lanes)

    def _per_region(row):
        return summ[:, row].reshape(-1)[:n_regions]

    pre_s, pre_n, has_brk = _per_region(0), _per_region(1), _per_region(2)
    post_s, post_c = _per_region(3), _per_region(4)
    tail_l, tail_c = _per_region(5), _per_region(6)

    # The reference carries (loss0, cnt) across regions WITHOUT resetting after
    # the end-of-region append, so region r's first segment depends on region
    # r-1.  Stitch the carry-independent per-region summaries with a tiny scan.
    def _stitch(carry, xs):
        lo, cn, a_sum, a_cnt = carry
        prs, prn, hb, pos, poc, tl, tcn = xs
        has_break = hb > 0.5

        # Branch A: the region contains at least one sign change.
        n1 = cn + prn
        v1 = (lo + prs) / jnp.maximum(n1, 1.0)
        add1 = jnp.logical_and(n1 > 0.0, jnp.logical_not(jnp.isnan(v1)))
        vt = tl / jnp.maximum(tcn, 1.0)
        addt = jnp.logical_and(tcn > 0.0, jnp.logical_not(jnp.isnan(vt)))
        sum_b = a_sum + jnp.where(add1, v1, 0.0) + pos + jnp.where(addt, vt, 0.0)
        cnt_b = a_cnt + jnp.where(add1, 1.0, 0.0) + poc + jnp.where(addt, 1.0, 0.0)

        # Branch B: no sign change -> the carried run just keeps growing.
        lo_n = lo + prs
        cn_n = cn + prn
        vn = lo_n / jnp.maximum(cn_n, 1.0)
        addn = jnp.logical_and(cn_n > 0.0, jnp.logical_not(jnp.isnan(vn)))
        sum_n = a_sum + jnp.where(addn, vn, 0.0)
        cnt_n = a_cnt + jnp.where(addn, 1.0, 0.0)

        lo = jnp.where(has_break, tl, lo_n)
        cn = jnp.where(has_break, tcn, cn_n)
        a_sum = jnp.where(has_break, sum_b, sum_n)
        a_cnt = jnp.where(has_break, cnt_b, cnt_n)
        return (lo, cn, a_sum, a_cnt), None

    init = (jnp.float32(0.0), jnp.float32(0.0), jnp.float32(0.0), jnp.float32(0.0))
    (_, _, a_sum, a_cnt), _ = jax.lax.scan(
        _stitch, init, (pre_s, pre_n, has_brk, post_s, post_c, tail_l, tail_c))

    # TODO(synk): np.nanmean returns NaN when *every* segment mean is NaN; we skip
    # NaN segment means and return 0.0 in that degenerate case.
    return jnp.where(a_cnt > 0.0, a_sum / jnp.maximum(a_cnt, 1.0), jnp.float32(0.0))


def _reference_forward(output, results):
    """Direct NumPy port of RmseLoss_mcp.forward / calculate_mean_squared_increment
    (including its carry of loss0/cnt across regions)."""
    data = np.asarray(output)[:, :, 0:1]
    x_rainsign = np.asarray(results)[:, :, 0:1]
    loss0 = 0.0
    cnt = 0
    a = []
    for region in range(data.shape[1]):
        for day in range(1, data.shape[0]):
            if x_rainsign[day, region, 0] == x_rainsign[day - 1, region, 0]:
                d1 = float(data[day, region, 0])
                d2 = float(data[day - 1, region, 0])
                loss0 = loss0 + (d1 - d2) ** 2
                cnt = cnt + 1
            else:
                if cnt > 0:
                    a.append(loss0 / cnt)
                loss0 = 0.0
                cnt = 0
        if cnt > 0:
            a.append(loss0 / cnt)
    if len(a) > 0:
        return float(np.nanmean(a))
    return 0.0


if __name__ == "__main__":
    # Small shapes consistent with the module's [seq, batch, features] inputs.
    T, B, C = 70, 13, 2
    key = jax.random.PRNGKey(0)
    k1, k2, k3 = jax.random.split(key, 3)

    output = jax.random.normal(k1, (T, B, C), dtype=jnp.float32)
    rain_sign = jax.random.bernoulli(k2, p=0.5, shape=(T, B, 1)).astype(jnp.float32)
    extra = jax.random.normal(k3, (T, B, 1), dtype=jnp.float32)
    results = jnp.concatenate([rain_sign, extra], axis=-1)   # channel 0 = rain sign

    loss = jax.jit(rmse_loss_mcp)(output, results)
    loss = jax.block_until_ready(loss)

    ref = _reference_forward(np.asarray(output), np.asarray(results))
    assert abs(float(loss) - ref) <= 1e-4 * max(1.0, abs(ref)), (float(loss), ref)

    print("KERNEL_OK")
</pallas_src>

<mosaic_0001>
module attributes {stable_mosaic.version = 11 : i64} {
  func.func @_msi_kernel(%arg0: i32, %arg1: i32, %arg2: memref<72x1x128xf32, #tpu.memory_space<vmem>>, %arg3: memref<72x1x128xf32, #tpu.memory_space<vmem>>, %arg4: memref<8x1x128xf32, #tpu.memory_space<vmem>>, %arg5: memref<1x128xf32, #tpu.memory_space<vmem>>, %arg6: memref<1x128xf32, #tpu.memory_space<vmem>>, %arg7: memref<1x128xf32, #tpu.memory_space<vmem>>, %arg8: memref<1x128xf32, #tpu.memory_space<vmem>>, %arg9: memref<1x128xf32, #tpu.memory_space<vmem>>, %arg10: memref<1x128xf32, #tpu.memory_space<vmem>>, %arg11: memref<1x128xf32, #tpu.memory_space<vmem>>, %arg12: memref<1x128xf32, #tpu.memory_space<vmem>>, %arg13: memref<1x128xf32, #tpu.memory_space<vmem>>) attributes {dimension_semantics = [#tpu.dimension_semantics<parallel>, #tpu.dimension_semantics<arbitrary>], iteration_bounds = array<i64: 1, 1>, scalar_prefetch = 0 : i64, scratch_operands = 9 : i64, tpu.core_type = #tpu.core_type<tc>, window_params = [{transform_indices = @transform_0, window_bounds = array<i64: 72, 1, 128>}, {transform_indices = @transform_1, window_bounds = array<i64: 72, 1, 128>}, {transform_indices = @transform_2, window_bounds = array<i64: 8, 1, 128>}]} {
    %c0_i32 = arith.constant 0 : i32
    %0 = arith.cmpi eq, %arg1, %c0_i32 : i32
    %1 = arith.extui %0 : i1 to i32
    %c0_i32_0 = arith.constant 0 : i32
    %2 = arith.cmpi ne, %1, %c0_i32_0 : i32
    scf.if %2 {
      %cst = arith.constant 0.000000e+00 : f32
      %32 = vector.broadcast %cst : f32 to vector<1x128xf32>
      %c0_42 = arith.constant 0 : index
      %c0_43 = arith.constant 0 : index
      %33 = vector.load %arg5[%c0_42, %c0_43] : memref<1x128xf32, #tpu.memory_space<vmem>>, vector<1x128xf32>
      tpu.vector_store %arg5[%c0_42, %c0_43], %32 {strides = array<i32>} : memref<1x128xf32, #tpu.memory_space<vmem>>, vector<1x128xf32>,
      %c0_44 = arith.constant 0 : index
      %c0_45 = arith.constant 0 : index
      %34 = vector.load %arg6[%c0_44, %c0_45] : memref<1x128xf32, #tpu.memory_space<vmem>>, vector<1x128xf32>
      tpu.vector_store %arg6[%c0_44, %c0_45], %32 {strides = array<i32>} : memref<1x128xf32, #tpu.memory_space<vmem>>, vector<1x128xf32>,
      %c0_46 = arith.constant 0 : index
      %c0_47 = arith.constant 0 : index
      %35 = vector.load %arg9[%c0_46, %c0_47] : memref<1x128xf32, #tpu.memory_space<vmem>>, vector<1x128xf32>
      tpu.vector_store %arg9[%c0_46, %c0_47], %32 {strides = array<i32>} : memref<1x128xf32, #tpu.memory_space<vmem>>, vector<1x128xf32>,
      %c0_48 = arith.constant 0 : index
      %c0_49 = arith.constant 0 : index
      %36 = vector.load %arg10[%c0_48, %c0_49] : memref<1x128xf32, #tpu.memory_space<vmem>>, vector<1x128xf32>
      tpu.vector_store %arg10[%c0_48, %c0_49], %32 {strides = array<i32>} : memref<1x128xf32, #tpu.memory_space<vmem>>, vector<1x128xf32>,
      %c0_50 = arith.constant 0 : index
      %c0_51 = arith.constant 0 : index
      %37 = vector.load %arg11[%c0_50, %c0_51] : memref<1x128xf32, #tpu.memory_space<vmem>>, vector<1x128xf32>
      tpu.vector_store %arg11[%c0_50, %c0_51], %32 {strides = array<i32>} : memref<1x128xf32, #tpu.memory_space<vmem>>, vector<1x128xf32>,
      %c0_52 = arith.constant 0 : index
      %c0_53 = arith.constant 0 : index
      %38 = vector.load %arg12[%c0_52, %c0_53] : memref<1x128xf32, #tpu.memory_space<vmem>>, vector<1x128xf32>
      tpu.vector_store %arg12[%c0_52, %c0_53], %32 {strides = array<i32>} : memref<1x128xf32, #tpu.memory_space<vmem>>, vector<1x128xf32>,
      %c0_54 = arith.constant 0 : index
      %c0_55 = arith.constant 0 : index
      %39 = vector.load %arg13[%c0_54, %c0_55] : memref<1x128xf32, #tpu.memory_space<vmem>>, vector<1x128xf32>
      tpu.vector_store %arg13[%c0_54, %c0_55], %32 {strides = array<i32>} : memref<1x128xf32, #tpu.memory_space<vmem>>, vector<1x128xf32>,
      %c0_56 = arith.constant 0 : index
      %c0_57 = arith.constant 0 : index
      %c0_58 = arith.constant 0 : index
      %40 = vector.load %arg2[%c0_56, %c0_57, %c0_58] : memref<72x1x128xf32, #tpu.memory_space<vmem>>, vector<1x1x128xf32>
      %41 = vector.shape_cast %40 : vector<1x1x128xf32> to vector<1x128xf32>
      %c0_59 = arith.constant 0 : index
      %c0_60 = arith.constant 0 : index
      %42 = vector.load %arg7[%c0_59, %c0_60] : memref<1x128xf32, #tpu.memory_space<vmem>>, vector<1x128xf32>
      tpu.vector_store %arg7[%c0_59, %c0_60], %41 {strides = array<i32>} : memref<1x128xf32, #tpu.memory_space<vmem>>, vector<1x128xf32>,
      %c0_61 = arith.constant 0 : index
      %c0_62 = arith.constant 0 : index
      %c0_63 = arith.constant 0 : index
      %43 = vector.load %arg3[%c0_61, %c0_62, %c0_63] : memref<72x1x128xf32, #tpu.memory_space<vmem>>, vector<1x1x128xf32>
      %44 = vector.shape_cast %43 : vector<1x1x128xf32> to vector<1x128xf32>
      %c0_64 = arith.constant 0 : index
      %c0_65 = arith.constant 0 : index
      %45 = vector.load %arg8[%c0_64, %c0_65] : memref<1x128xf32, #tpu.memory_space<vmem>>, vector<1x128xf32>
      tpu.vector_store %arg8[%c0_64, %c0_65], %44 {strides = array<i32>} : memref<1x128xf32, #tpu.memory_space<vmem>>, vector<1x128xf32>,
    } else {
    }
    %c0_i32_1 = arith.constant 0 : i32
    %3 = arith.cmpi eq, %arg1, %c0_i32_1 : i32
    %c1_i32 = arith.constant 1 : i32
    %c0_i32_2 = arith.constant 0 : i32
    %4 = arith.select %3, %c1_i32, %c0_i32_2 : i32
    %c72_i32 = arith.constant 72 : i32
    %5 = arith.muli %arg1, %c72_i32 : i32
    %c70_i32 = arith.constant 70 : i32
    %6 = arith.subi %c70_i32, %5 : i32
    %c72_i32_3 = arith.constant 72 : i32
    %7 = arith.minsi %c72_i32_3, %6 : i32
    %c0 = arith.constant 0 : index
    %c0_4 = arith.constant 0 : index
    %8 = vector.load %arg5[%c0, %c0_4] : memref<1x128xf32, #tpu.memory_space<vmem>>, vector<1x128xf32>
    %c0_5 = arith.constant 0 : index
    %c0_6 = arith.constant 0 : index
    %9 = vector.load %arg6[%c0_5, %c0_6] : memref<1x128xf32, #tpu.memory_space<vmem>>, vector<1x128xf32>
    %c0_7 = arith.constant 0 : index
    %c0_8 = arith.constant 0 : index
    %10 = vector.load %arg7[%c0_7, %c0_8] : memref<1x128xf32, #tpu.memory_space<vmem>>, vector<1x128xf32>
    %c0_9 = arith.constant 0 : index
    %c0_10 = arith.constant 0 : index
    %11 = vector.load %arg8[%c0_9, %c0_10] : memref<1x128xf32, #tpu.memory_space<vmem>>, vector<1x128xf32>
    %c0_11 = arith.constant 0 : index
    %c0_12 = arith.constant 0 : index
    %12 = vector.load %arg9[%c0_11, %c0_12] : memref<1x128xf32, #tpu.memory_space<vmem>>, vector<1x128xf32>
    %c0_13 = arith.constant 0 : index
    %c0_14 = arith.constant 0 : index
    %13 = vector.load %arg10[%c0_13, %c0_14] : memref<1x128xf32, #tpu.memory_space<vmem>>, vector<1x128xf32>
    %c0_15 = arith.constant 0 : index
    %c0_16 = arith.constant 0 : index
    %14 = vector.load %arg11[%c0_15, %c0_16] : memref<1x128xf32, #tpu.memory_space<vmem>>, vector<1x128xf32>
    %c0_17 = arith.constant 0 : index
    %c0_18 = arith.constant 0 : index
    %15 = vector.load %arg12[%c0_17, %c0_18] : memref<1x128xf32, #tpu.memory_space<vmem>>, vector<1x128xf32>
    %c0_19 = arith.constant 0 : index
    %c0_20 = arith.constant 0 : index
    %16 = vector.load %arg13[%c0_19, %c0_20] : memref<1x128xf32, #tpu.memory_space<vmem>>, vector<1x128xf32>
    %17 = arith.subi %7, %4 : i32
    %18 = arith.addi %4, %17 : i32
    %c1_i32_21 = arith.constant 1 : i32
    %19:9 = scf.for %arg14 = %4 to %18 step %c1_i32_21 iter_args(%arg15 = %8, %arg16 = %9, %arg17 = %10, %arg18 = %11, %arg19 = %12, %arg20 = %13, %arg21 = %14, %arg22 = %15, %arg23 = %16) -> (vector<1x128xf32>, vector<1x128xf32>, vector<1x128xf32>, vector<1x128xf32>, vector<1x128xf32>, vector<1x128xf32>, vector<1x128xf32>, vector<1x128xf32>, vector<1x128xf32>)  : i32 {
      %32 = arith.index_cast %arg14 : i32 to index
      %c0_42 = arith.constant 0 : index
      %c0_43 = arith.constant 0 : index
      %33 = vector.load %arg2[%32, %c0_42, %c0_43] : memref<72x1x128xf32, #tpu.memory_space<vmem>>, vector<1x1x128xf32>
      %34 = vector.shape_cast %33 : vector<1x1x128xf32> to vector<1x128xf32>
      %35 = arith.index_cast %arg14 : i32 to index
      %c0_44 = arith.constant 0 : index
      %c0_45 = arith.constant 0 : index
      %36 = vector.load %arg3[%35, %c0_44, %c0_45] : memref<72x1x128xf32, #tpu.memory_space<vmem>>, vector<1x1x128xf32>
      %37 = vector.shape_cast %36 : vector<1x1x128xf32> to vector<1x128xf32>
      %38 = arith.cmpf oeq, %37, %arg18 : vector<1x128xf32>
      %39 = arith.subf %34, %arg17 : vector<1x128xf32>
      %40 = arith.mulf %39, %39 : vector<1x128xf32>
      %cst = arith.constant dense<true> : vector<1x128xi1>
      %41 = arith.xori %38, %cst : vector<1x128xi1>
      %cst_46 = arith.constant 0.000000e+00 : f32
      %42 = vector.broadcast %cst_46 : f32 to vector<1x128xf32>
      %43 = arith.cmpf ogt, %arg16, %42 : vector<1x128xf32>
      %44 = arith.andi %41, %43 : vector<1x128xi1>
      %cst_47 = arith.constant 1.000000e+00 : f32
      %45 = vector.broadcast %cst_47 : f32 to vector<1x128xf32>
      %46 = arith.maximumf %arg16, %45 : vector<1x128xf32>
      %47 = arith.divf %arg15, %46 : vector<1x128xf32>
      %cst_48 = arith.constant 5.000000e-01 : f32
      %48 = vector.broadcast %cst_48 : f32 to vector<1x128xf32>
      %49 = arith.cmpf ogt, %arg19, %48 : vector<1x128xf32>
      %50 = arith.andi %44, %49 : vector<1x128xi1>
      %51 = arith.cmpf one, %47, %47 : vector<1x128xf32>
      %cst_49 = arith.constant dense<true> : vector<1x128xi1>
      %52 = arith.xori %51, %cst_49 : vector<1x128xi1>
      %53 = arith.andi %50, %52 : vector<1x128xi1>
      %cst_50 = arith.constant 0.000000e+00 : f32
      %54 = vector.broadcast %cst_50 : f32 to vector<1x128xf32>
      %55 = arith.select %53, %47, %54 : vector<1x128xi1>, vector<1x128xf32>
      %56 = arith.addf %arg22, %55 : vector<1x128xf32>
      %cst_51 = arith.constant 1.000000e+00 : f32
      %cst_52 = arith.constant 0.000000e+00 : f32
      %57 = vector.broadcast %cst_51 : f32 to vector<1x128xf32>
      %58 = vector.broadcast %cst_52 : f32 to vector<1x128xf32>
      %59 = arith.select %53, %57, %58 : vector<1x128xi1>, vector<1x128xf32>
      %60 = arith.addf %arg23, %59 : vector<1x128xf32>
      %61 = arith.addf %arg15, %40 : vector<1x128xf32>
      %cst_53 = arith.constant 0.000000e+00 : f32
      %62 = vector.broadcast %cst_53 : f32 to vector<1x128xf32>
      %63 = arith.select %38, %61, %62 : vector<1x128xi1>, vector<1x128xf32>
      %cst_54 = arith.constant 1.000000e+00 : f32
      %64 = vector.broadcast %cst_54 : f32 to vector<1x128xf32>
      %65 = arith.addf %arg16, %64 : vector<1x128xf32>
      %cst_55 = arith.constant 0.000000e+00 : f32
      %66 = vector.broadcast %cst_55 : f32 to vector<1x128xf32>
      %67 = arith.select %38, %65, %66 : vector<1x128xi1>, vector<1x128xf32>
      %68 = arith.select %38, %63, %arg15 : vector<1x128xi1>, vector<1x128xf32>
      %69 = arith.select %49, %arg20, %68 : vector<1x128xi1>, vector<1x128xf32>
      %70 = arith.select %38, %67, %arg16 : vector<1x128xi1>, vector<1x128xf32>
      %71 = arith.select %49, %arg21, %70 : vector<1x128xi1>, vector<1x128xf32>
      %72 = arith.extui %41 : vector<1x128xi1> to vector<1x128xi32>
      %73 = arith.sitofp %72 : vector<1x128xi32> to vector<1x128xf32>
      %74 = arith.maximumf %arg19, %73 : vector<1x128xf32>
      scf.yield %63, %67, %34, %37, %74, %69, %71, %56, %60 : vector<1x128xf32>, vector<1x128xf32>, vector<1x128xf32>, vector<1x128xf32>, vector<1x128xf32>, vector<1x128xf32>, vector<1x128xf32>, vector<1x128xf32>, vector<1x128xf32>
    }
    %c0_22 = arith.constant 0 : index
    %c0_23 = arith.constant 0 : index
    %20 = vector.load %arg5[%c0_22, %c0_23] : memref<1x128xf32, #tpu.memory_space<vmem>>, vector<1x128xf32>
    tpu.vector_store %arg5[%c0_22, %c0_23], %19#0 {strides = array<i32>} : memref<1x128xf32, #tpu.memory_space<vmem>>, vector<1x128xf32>,
    %c0_24 = arith.constant 0 : index
    %c0_25 = arith.constant 0 : index
    %21 = vector.load %arg6[%c0_24, %c0_25] : memref<1x128xf32, #tpu.memory_space<vmem>>, vector<1x128xf32>
    tpu.vector_store %arg6[%c0_24, %c0_25], %19#1 {strides = array<i32>} : memref<1x128xf32, #tpu.memory_space<vmem>>, vector<1x128xf32>,
    %c0_26 = arith.constant 0 : index
    %c0_27 = arith.constant 0 : index
    %22 = vector.load %arg7[%c0_26, %c0_27] : memref<1x128xf32, #tpu.memory_space<vmem>>, vector<1x128xf32>
    tpu.vector_store %arg7[%c0_26, %c0_27], %19#2 {strides = array<i32>} : memref<1x128xf32, #tpu.memory_space<vmem>>, vector<1x128xf32>,
    %c0_28 = arith.constant 0 : index
    %c0_29 = arith.constant 0 : index
    %23 = vector.load %arg8[%c0_28, %c0_29] : memref<1x128xf32, #tpu.memory_space<vmem>>, vector<1x128xf32>
    tpu.vector_store %arg8[%c0_28, %c0_29], %19#3 {strides = array<i32>} : memref<1x128xf32, #tpu.memory_space<vmem>>, vector<1x128xf32>,
    %c0_30 = arith.constant 0 : index
    %c0_31 = arith.constant 0 : index
    %24 = vector.load %arg9[%c0_30, %c0_31] : memref<1x128xf32, #tpu.memory_space<vmem>>, vector<1x128xf32>
    tpu.vector_store %arg9[%c0_30, %c0_31], %19#4 {strides = array<i32>} : memref<1x128xf32, #tpu.memory_space<vmem>>, vector<1x128xf32>,
    %c0_32 = arith.constant 0 : index
    %c0_33 = arith.constant 0 : index
    %25 = vector.load %arg10[%c0_32, %c0_33] : memref<1x128xf32, #tpu.memory_space<vmem>>, vector<1x128xf32>
    tpu.vector_store %arg10[%c0_32, %c0_33], %19#5 {strides = array<i32>} : memref<1x128xf32, #tpu.memory_space<vmem>>, vector<1x128xf32>,
    %c0_34 = arith.constant 0 : index
    %c0_35 = arith.constant 0 : index
    %26 = vector.load %arg11[%c0_34, %c0_35] : memref<1x128xf32, #tpu.memory_space<vmem>>, vector<1x128xf32>
    tpu.vector_store %arg11[%c0_34, %c0_35], %19#6 {strides = array<i32>} : memref<1x128xf32, #tpu.memory_space<vmem>>, vector<1x128xf32>,
    %c0_36 = arith.constant 0 : index
    %c0_37 = arith.constant 0 : index
    %27 = vector.load %arg12[%c0_36, %c0_37] : memref<1x128xf32, #tpu.memory_space<vmem>>, vector<1x128xf32>
    tpu.vector_store %arg12[%c0_36, %c0_37], %19#7 {strides = array<i32>} : memref<1x128xf32, #tpu.memory_space<vmem>>, vector<1x128xf32>,
    %c0_38 = arith.constant 0 : index
    %c0_39 = arith.constant 0 : index
    %28 = vector.load %arg13[%c0_38, %c0_39] : memref<1x128xf32, #tpu.memory_space<vmem>>, vector<1x128xf32>
    tpu.vector_store %arg13[%c0_38, %c0_39], %19#8 {strides = array<i32>} : memref<1x128xf32, #tpu.memory_space<vmem>>, vector<1x128xf32>,
    %c0_i32_40 = arith.constant 0 : i32
    %29 = arith.cmpi eq, %arg1, %c0_i32_40 : i32
    %30 = arith.extui %29 : i1 to i32
    %c0_i32_41 = arith.constant 0 : i32
    %31 = arith.cmpi ne, %30, %c0_i32_41 : i32
    scf.if %31 {
      %c0_42 = arith.constant 0 : index
      %c0_43 = arith.constant 0 : index
      %c0_44 = arith.constant 0 : index
      %32 = vector.load %arg4[%c0_42, %c0_43, %c0_44] : memref<8x1x128xf32, #tpu.memory_space<vmem>>, vector<1x1x128xf32>
      %33 = vector.shape_cast %32 : vector<1x1x128xf32> to vector<1x128xf32>
      %34 = vector.shape_cast %19#5 : vector<1x128xf32> to vector<1x1x128xf32>
      tpu.vector_store %arg4[%c0_42, %c0_43, %c0_44], %34 {strides = array<i32>} : memref<8x1x128xf32, #tpu.memory_space<vmem>>, vector<1x1x128xf32>,
      %c1 = arith.constant 1 : index
      %c0_45 = arith.constant 0 : index
      %c0_46 = arith.constant 0 : index
      %35 = vector.load %arg4[%c1, %c0_45, %c0_46] : memref<8x1x128xf32, #tpu.memory_space<vmem>>, vector<1x1x128xf32>
      %36 = vector.shape_cast %35 : vector<1x1x128xf32> to vector<1x128xf32>
      %37 = vector.shape_cast %19#6 : vector<1x128xf32> to vector<1x1x128xf32>
      tpu.vector_store %arg4[%c1, %c0_45, %c0_46], %37 {strides = array<i32>} : memref<8x1x128xf32, #tpu.memory_space<vmem>>, vector<1x1x128xf32>,
      %c2 = arith.constant 2 : index
      %c0_47 = arith.constant 0 : index
      %c0_48 = arith.constant 0 : index
      %38 = vector.load %arg4[%c2, %c0_47, %c0_48] : memref<8x1x128xf32, #tpu.memory_space<vmem>>, vector<1x1x128xf32>
      %39 = vector.shape_cast %38 : vector<1x1x128xf32> to vector<1x128xf32>
      %40 = vector.shape_cast %19#4 : vector<1x128xf32> to vector<1x1x128xf32>
      tpu.vector_store %arg4[%c2, %c0_47, %c0_48], %40 {strides = array<i32>} : memref<8x1x128xf32, #tpu.memory_space<vmem>>, vector<1x1x128xf32>,
      %c3 = arith.constant 3 : index
      %c0_49 = arith.constant 0 : index
      %c0_50 = arith.constant 0 : index
      %41 = vector.load %arg4[%c3, %c0_49, %c0_50] : memref<8x1x128xf32, #tpu.memory_space<vmem>>, vector<1x1x128xf32>
      %42 = vector.shape_cast %41 : vector<1x1x128xf32> to vector<1x128xf32>
      %43 = vector.shape_cast %19#7 : vector<1x128xf32> to vector<1x1x128xf32>
      tpu.vector_store %arg4[%c3, %c0_49, %c0_50], %43 {strides = array<i32>} : memref<8x1x128xf32, #tpu.memory_space<vmem>>, vector<1x1x128xf32>,
      %c4 = arith.constant 4 : index
      %c0_51 = arith.constant 0 : index
      %c0_52 = arith.constant 0 : index
      %44 = vector.load %arg4[%c4, %c0_51, %c0_52] : memref<8x1x128xf32, #tpu.memory_space<vmem>>, vector<1x1x128xf32>
      %45 = vector.shape_cast %44 : vector<1x1x128xf32> to vector<1x128xf32>
      %46 = vector.shape_cast %19#8 : vector<1x128xf32> to vector<1x1x128xf32>
      tpu.vector_store %arg4[%c4, %c0_51, %c0_52], %46 {strides = array<i32>} : memref<8x1x128xf32, #tpu.memory_space<vmem>>, vector<1x1x128xf32>,
      %c5 = arith.constant 5 : index
      %c0_53 = arith.constant 0 : index
      %c0_54 = arith.constant 0 : index
      %47 = vector.load %arg4[%c5, %c0_53, %c0_54] : memref<8x1x128xf32, #tpu.memory_space<vmem>>, vector<1x1x128xf32>
      %48 = vector.shape_cast %47 : vector<1x1x128xf32> to vector<1x128xf32>
      %49 = vector.shape_cast %19#0 : vector<1x128xf32> to vector<1x1x128xf32>
      tpu.vector_store %arg4[%c5, %c0_53, %c0_54], %49 {strides = array<i32>} : memref<8x1x128xf32, #tpu.memory_space<vmem>>, vector<1x1x128xf32>,
      %c6 = arith.constant 6 : index
      %c0_55 = arith.constant 0 : index
      %c0_56 = arith.constant 0 : index
      %50 = vector.load %arg4[%c6, %c0_55, %c0_56] : memref<8x1x128xf32, #tpu.memory_space<vmem>>, vector<1x1x128xf32>
      %51 = vector.shape_cast %50 : vector<1x1x128xf32> to vector<1x128xf32>
      %52 = vector.shape_cast %19#1 : vector<1x128xf32> to vector<1x1x128xf32>
      tpu.vector_store %arg4[%c6, %c0_55, %c0_56], %52 {strides = array<i32>} : memref<8x1x128xf32, #tpu.memory_space<vmem>>, vector<1x1x128xf32>,
      %cst = arith.constant 0.000000e+00 : f32
      %53 = vector.broadcast %cst : f32 to vector<1x128xf32>
      %c7 = arith.constant 7 : index
      %c0_57 = arith.constant 0 : index
      %c0_58 = arith.constant 0 : index
      %54 = vector.load %arg4[%c7, %c0_57, %c0_58] : memref<8x1x128xf32, #tpu.memory_space<vmem>>, vector<1x1x128xf32>
      %55 = vector.shape_cast %54 : vector<1x1x128xf32> to vector<1x128xf32>
      %56 = vector.shape_cast %53 : vector<1x128xf32> to vector<1x1x128xf32>
      tpu.vector_store %arg4[%c7, %c0_57, %c0_58], %56 {strides = array<i32>} : memref<8x1x128xf32, #tpu.memory_space<vmem>>, vector<1x1x128xf32>,
    } else {
    }
    return
  }
  func.func @transform_0(%arg0: i32, %arg1: i32) -> (i32, i32, i32) {
    %c0_i32 = arith.constant 0 : i32
    %c0_i32_0 = arith.constant 0 : i32
    return %arg1, %arg0, %c0_i32 : i32, i32, i32
  }
  func.func @transform_1(%arg0: i32, %arg1: i32) -> (i32, i32, i32) {
    %c0_i32 = arith.constant 0 : i32
    %c0_i32_0 = arith.constant 0 : i32
    return %arg1, %arg0, %c0_i32 : i32, i32, i32
  }
  func.func @transform_2(%arg0: i32, %arg1: i32) -> (i32, i32, i32) {
    %c0_i32 = arith.constant 0 : i32
    %c0_i32_0 = arith.constant 0 : i32
    %c0_i32_1 = arith.constant 0 : i32
    return %arg0, %c0_i32, %c0_i32_0 : i32, i32, i32
  }
}

</mosaic_0001>

<bundles_post_ra>
// kernel: rmse_loss_mcp.1
= control target key start
LH: loop header
LB: loop body
LE: loop exit
PB: predicated region body
PF: predicated region fallthrough
CT: control target
= control target key end

     0   :  { %v326_v0 = vmov 0.0   ;;  %s371_s13 = smov 1   ;;  %s460_s2 = inlined_call_operand.vmem [shape: f32[8,1,128], index: 2, kind: output, shape index: {}]   ;;  %s461_s0 = inlined_call_operand.vmem [shape: f32[72,1,128], index: 0, kind: input, shape index: {}]   ;;  %s462_s1 = inlined_call_operand.vmem [shape: f32[72,1,128], index: 1, kind: input, shape index: {}]  }
   0x1   :  { %15 = vst [vmem:[#allocation2] sm:$0x1] %v326_v0  ;;  %16 = vst [vmem:[#allocation3] sm:$0x1] %v326_v0  ;;  %v22_v1 = vld [vmem:[%s461_s0] sm:$0x1] }
   0x2   :  { %17 = vst [vmem:[#allocation6] sm:$0x1] %v326_v0  ;;  %18 = vst [vmem:[#allocation7] sm:$0x1] %v326_v0  ;;  %v24_v2 = vld [vmem:[%s462_s1] sm:$0x1] }
   0x3   :  { %19 = vst [vmem:[#allocation8] sm:$0x1] %v326_v0  ;;  %20 = vst [vmem:[#allocation9] sm:$0x1] %v326_v0 }
   0x4   :  { %21 = vst [vmem:[#allocation10] sm:$0x1] %v326_v0  ;;  %23 = vst [vmem:[#allocation4] sm:$0x1] %v22_v1 }
   0x5   :  { %25 = vst [vmem:[#allocation5] sm:$0x1] %v24_v2 }
   0x8   :  { %v31_v3 = vld [vmem:[#allocation2] sm:$0x1]   ;;  %v32_v4 = vld [vmem:[#allocation3] sm:$0x1]  }
   0x9   :  { %v35_v5 = vld [vmem:[#allocation6] sm:$0x1]   ;;  %v36_v6 = vld [vmem:[#allocation7] sm:$0x1]   ;;  %v314_v12 = vmov %v32_v4   ;;  %v318_v13 = vmov %v31_v3  }
   0xa   :  { %v37_v7 = vld [vmem:[#allocation8] sm:$0x1]   ;;  %v38_v8 = vld [vmem:[#allocation9] sm:$0x1]  }
   0xb   :  { %v39_v9 = vld [vmem:[#allocation10] sm:$0x1]   ;;  %v33_v10 = vld [vmem:[#allocation4] sm:$0x1]  }
   0xc   :  { %v34_v11 = vld [vmem:[#allocation5] sm:$0x1]  }
   0xd LB: > { %s55_s16 = scalar_lea.vmem %s461_s0, %s324_s13  ;;  %s57_s19 = scalar_lea.vmem %s462_s1, %s324_s13  ;;  %v65_v18 = vmax.f32 %v316_v12, 1.0  ;;  %vm327_vm1 = vmmov 1   ;;  %v79_v21 = vadd.f32 1.0, %v316_v12  ;;  %vm68_vm3 = vcmp.gt.f32.partialorder %v304_v5, 0.5  ;;  %s324_s13 = sphi %s371_s13, %s43_s13   ;;  %v320_v13 = vphi %v318_v13, %v319_v13   ;;  %v316_v12 = vphi %v314_v12, %v315_v12   ;;  %v312_v10 = vphi %v33_v10, %v473_v10   ;;  %v308_v11 = vphi %v34_v11, %v472_v11   ;;  %v304_v5 = vphi %v35_v5, %v471_v5   ;;  %v300_v6 = vphi %v36_v6, %v470_v6   ;;  %v296_v7 = vphi %v37_v7, %v469_v7   ;;  %v292_v8 = vphi %v38_v8, %v468_v8   ;;  %v288_v9 = vphi %v39_v9, %v467_v9  }
   0xe   : > { %v56_v14 = vld [vmem:[%s55_s16] sm:$0x1]   ;;  %v328_v22 = vmov 0.0   ;;  %vm63_vm4 = vcmp.gt.f32.partialorder %v316_v12, 0.0  ;;  %s43_s13 = sadd.s32 1, %s324_s13  }
   0xf   : > { %v58_v15 = vld [vmem:[%s57_s19] sm:$0x1]   ;;  %v60_v17 = vsub.f32 %v56_v14, %v312_v10  ;;  %244 = vrcp.f32 %v65_v18  ;;  %p42_p0 = scmp.ge.s32.totalorder %s43_s13, 70  ;;  %v473_v10 = vmov %v56_v14 }
  0x10   : > { %vm391_vm0 = vcmp.eq.f32.partialorder %v58_v15, %v308_v11  ;;  %v472_v11 = vmov %v58_v15  ;;  %90 = vst [vmem:[#allocation4] sm:$0x1] (%p42_p0), %v56_v14  ;;  %91 = vst [vmem:[#allocation5] sm:$0x1] (%p42_p0), %v58_v15 }
  0x11   : > { %v61_v19 = vmul.f32 %v60_v17, %v60_v17  ;;  %vm398_vm2 = vmxor %vm391_vm0, %vm327_vm1  ;;  %v80_v25 = vsel %vm391_vm0, %v79_v21, 0.0   ;;  %v83_v26 = vsel %vm391_vm0, %v79_v21, %v316_v12  ;;  %160 = vst [vmem:[%s460_s2 + $0x7] sm:$0x1] (%p42_p0), %v326_v0 }
  0x12   : > { %v153_v23 = vsel %vm398_vm2, 1.0, %v328_v22  ;;  %v84_v28 = vsel %vm68_vm3, %v296_v7, %v83_v26   ;;  %vm64_vm5 = vmand %vm398_vm2, %vm63_vm4  ;;  %v315_v12 = vmov %v80_v25   ;;  %89 = vst [vmem:[#allocation3] sm:$0x1] (%p42_p0), %v80_v25 }
  0x13   : > { %v77_v24 = vadd.f32 %v320_v13, %v61_v19  ;;  %v87_v27 = vmax.f32 %v304_v5, %v153_v23   ;;  %vm69_vm6 = vmand %vm64_vm5, %vm68_vm3  ;;  %v469_v7 = vmov %v84_v28  ;;  %94 = vst [vmem:[#allocation8] sm:$0x1] (%p42_p0), %v84_v28 }
  0x14   :  { %154 = vst [vmem:[%s460_s2 + $0x1] sm:$0x1] (%p42_p0), %v84_v28  ;;  %159 = vst [vmem:[%s460_s2 + $0x6] sm:$0x1] (%p42_p0), %v80_v25 }
  0x15   : > { %v78_v29 = vsel %vm391_vm0, %v77_v24, 0.0   ;;  %v81_v30 = vsel %vm391_vm0, %v77_v24, %v320_v13  ;;  %v471_v5 = vmov %v87_v27  ;;  %92 = vst [vmem:[#allocation6] sm:$0x1] (%p42_p0), %v87_v27  ;;  %155 = vst [vmem:[%s460_s2 + $0x2] sm:$0x1] (%p42_p0), %v87_v27 }
  0x16   : > { %v82_v31 = vsel %vm68_vm3, %v300_v6, %v81_v30   ;;  %88 = vst [vmem:[#allocation2] sm:$0x1] (%p42_p0), %v78_v29  ;;  %158 = vst [vmem:[%s460_s2 + $0x5] sm:$0x1] (%p42_p0), %v78_v29 }
  0x17   : > { %v470_v6 = vmov %v82_v31  ;;  %93 = vst [vmem:[#allocation7] sm:$0x1] (%p42_p0), %v82_v31  ;;  %100 = vst [vmem:[%s460_s2] sm:$0x1] (%p42_p0), %v82_v31 }
  0x19   : > { %v245_v32 = vpop.eup %244 }
  0x1a   : > { %v67_v33 = vmul.f32 %v320_v13, %v245_v32  ;;  %v319_v13 = vmov %v78_v29  }
  0x1c   : > { %vm70_vm7 = vcmp.ne.f32.partialorder %v67_v33, %v67_v33  ;;  %45 = sbr.rel (!%p42_p0) target bundleno = 13 (0xd), region = 52 }
  0x1d   : > { %vm71_vm8 = vmxor %vm70_vm7, %vm327_vm1 }
  0x1e   : > { %vm72_vm9 = vmand %vm69_vm6, %vm71_vm8 }
  0x1f   : > { %v73_v34 = vsel %vm72_vm9, %v67_v33, 0.0  ;;  %v75_v35 = vsel %vm72_vm9, 1.0, %v328_v22 }
  0x20   : > { %v74_v36 = vadd.f32 %v292_v8, %v73_v34   ;;  %v76_v37 = vadd.f32 %v288_v9, %v75_v35  }
  0x22   : > { %v467_v9 = vmov %v76_v37  ;;  %v468_v8 = vmov %v74_v36  ;;  %95 = vst [vmem:[#allocation9] sm:$0x1] (%p42_p0), %v74_v36  ;;  %96 = vst [vmem:[#allocation10] sm:$0x1] (%p42_p0), %v76_v37 }
  0x23   :  { %156 = vst [vmem:[%s460_s2 + $0x3] sm:$0x1] %v74_v36  ;;  %157 = vst [vmem:[%s460_s2 + $0x4] sm:$0x1] %v76_v37 }

</bundles_post_ra>
